<compile_context>
chip_gen: v7x
topology: tpu7x:2x2x1
jax: 0.10.0
libtpu: 0.0.40
codegen_flags: <defaults>
</compile_context>

<pallas_src>
from functools import partial

import jax
import jax.numpy as jnp
from jax.experimental import pallas as pl
from jax.experimental.pallas import tpu as pltpu

_LANES = 128
_SUBLANES = 8


def _round_up(a: int, m: int) -> int:
    return (a + m - 1) // m * m


def _cdiv(a: int, m: int) -> int:
    return (a + m - 1) // m


def nsp_kernel(x_ref, w_ref, b_ref, o_ref):
    # x_ref: (tb, D)      CLS-token activations (f32 or bf16)
    # w_ref: (D, N_pad)   weight, pre-transposed + lane-padded
    # b_ref: (1, N_pad)   bias, f32, lane-padded
    # o_ref: (tb, N_pad)  f32 logits
    acc = jnp.dot(x_ref[...], w_ref[...], preferred_element_type=jnp.float32)
    o_ref[...] = (acc + b_ref[...]).astype(o_ref.dtype)


def prepare_nsp_params(w, b):
    """One-time parameter prep: transpose + lane-pad the (2, D) Linear weight.

    Call once at parameter-load time and reuse the result every step; this
    must not run in the per-step forward path.
    """
    n_cls, d = w.shape
    n_pad = _round_up(n_cls, _LANES)
    w_t = jnp.zeros((d, n_pad), dtype=w.dtype).at[:, :n_cls].set(w.T)
    b_p = jnp.zeros((1, n_pad), dtype=jnp.float32).at[0, :n_cls].set(
        b.astype(jnp.float32)
    )
    return w_t, b_p


@partial(jax.jit, static_argnames=("n_cls", "tile_b"))
def nsp_forward(x, w_t, b_p, *, n_cls=2, tile_b=1024):
    """NextSentencePrediction forward.

    x:   (B, S, D) token embeddings (f32 or bf16)
    w_t: (D, N_pad) pre-padded weight from prepare_nsp_params
    b_p: (1, N_pad) pre-padded f32 bias from prepare_nsp_params
    returns: (B, n_cls) f32 logits
    """
    B, S, D = x.shape
    N_pad = w_t.shape[1]

    # CLS-token gather; fused by XLA into the strided copy feeding the kernel
    # operand because it lives in the same jit as the pallas_call.
    x0 = x[:, 0, :]                                     # (B, D)

    # Pad batch only to a sublane multiple (<= 7 rows); tile-granularity
    # remainders are handled by Pallas' masked partial blocks.
    B_pad = _round_up(B, _SUBLANES)
    if B_pad != B:
        x0 = jnp.pad(x0, ((0, B_pad - B), (0, 0)))

    x_size = x.dtype.itemsize
    w_size = w_t.dtype.itemsize

    # --- row-tile sizing (VMEM-budget derived) -----------------------------
    fixed_bytes = 2 * D * N_pad * w_size + 2 * N_pad * 4      # weight + bias bufs
    per_row_bytes = 2 * (D * x_size + N_pad * 4)              # x tile + out tile
    budget = 24 * 1024 * 1024                                  # safe on v7x (64 MiB)
    tb_cap = max(
        _SUBLANES,
        ((budget - fixed_bytes) // per_row_bytes) // _SUBLANES * _SUBLANES,
    )
    # Cap at ~half the rows so the grid has >= 2 steps when B allows it
    # (both v7x TensorCores get work); harmless on single-TC v5e/v6e.
    tb_half = _round_up(max(1, _cdiv(B_pad, 2)), _SUBLANES)
    tb = max(_SUBLANES, min(tile_b, tb_cap, tb_half))

    grid = (pl.cdiv(B_pad, tb),)

    vmem_limit = int(
        min(max(2 * (fixed_bytes + per_row_bytes * tb), 8 << 20), 64 << 20)
    )

    cost = pl.CostEstimate(
        flops=2 * B * D * N_pad,
        transcendentals=0,
        bytes_accessed=B * D * x_size + D * N_pad * w_size + B * N_pad * 4,
    )

    out = pl.pallas_call(
        nsp_kernel,
        out_shape=jax.ShapeDtypeStruct((B_pad, N_pad), jnp.float32),
        grid_spec=pl.GridSpec(
            grid=grid,
            in_specs=[
                pl.BlockSpec((tb, D), lambda i: (i, 0)),       # CLS activations
                pl.BlockSpec((D, N_pad), lambda i: (0, 0)),    # stationary weight
                pl.BlockSpec((1, N_pad), lambda i: (0, 0)),    # stationary bias
            ],
            out_specs=pl.BlockSpec((tb, N_pad), lambda i: (i, 0)),
        ),
        compiler_params=pltpu.CompilerParams(
            dimension_semantics=("parallel",),     # rows split across TCs on v7x
            vmem_limit_bytes=vmem_limit,
        ),
        cost_estimate=cost,
    )(x0, w_t, b_p)

    # Strip batch pad and lane padding of the class dim (fused in the jit).
    return out[:B, :n_cls]


def nsp_reference(x, w, b):
    # nn.Linear: y = x @ W^T + b, applied to the CLS token.
    return jnp.einsum("bd,nd->bn", x[:, 0, :], w) + b


if __name__ == "__main__":
    B, S, D = 2, 8, 128      # batch, seq, embedding_dim
    N_CLS = 2                # is-next / not-next

    key = jax.random.PRNGKey(0)
    kx, kw, kb = jax.random.split(key, 3)

    x = jax.random.normal(kx, (B, S, D), dtype=jnp.float32)
    w = jax.random.normal(kw, (N_CLS, D), dtype=jnp.float32) * 0.02
    b = jax.random.normal(kb, (N_CLS,), dtype=jnp.float32) * 0.02

    w_t, b_p = prepare_nsp_params(w, b)       # once, at param-prep time
    out = nsp_forward(x, w_t, b_p, n_cls=N_CLS)
    jax.block_until_ready(out)

    ref = nsp_reference(x, w, b)
    assert out.shape == (B, N_CLS)
    assert jnp.allclose(out, ref, atol=1e-4, rtol=1e-4)

    print("KERNEL_OK")
</pallas_src>

<mosaic_0001>
module attributes {stable_mosaic.version = 11 : i64} {
  func.func @nsp_kernel(%arg0: i32, %arg1: memref<8x128xf32, #tpu.memory_space<vmem>>, %arg2: memref<128x128xf32, #tpu.memory_space<vmem>>, %arg3: memref<1x128xf32, #tpu.memory_space<vmem>>, %arg4: memref<8x128xf32, #tpu.memory_space<vmem>>) attributes {dimension_semantics = [#tpu.dimension_semantics<parallel>], iteration_bounds = array<i64: 1>, scalar_prefetch = 0 : i64, scratch_operands = 0 : i64, tpu.core_type = #tpu.core_type<tc>, window_params = [{transform_indices = @transform_0, window_bounds = array<i64: 8, 128>}, {pipeline_mode = #tpu.pipeline_mode<synchronous>, transform_indices = @transform_1, window_bounds = array<i64: 128, 128>}, {pipeline_mode = #tpu.pipeline_mode<synchronous>, transform_indices = @transform_2, window_bounds = array<i64: 1, 128>}, {transform_indices = @transform_3, window_bounds = array<i64: 8, 128>}]} {
    %c0 = arith.constant 0 : index
    %c0_0 = arith.constant 0 : index
    %0 = vector.load %arg1[%c0, %c0_0] : memref<8x128xf32, #tpu.memory_space<vmem>>, vector<8x128xf32>
    %c0_1 = arith.constant 0 : index
    %c0_2 = arith.constant 0 : index
    %1 = vector.load %arg2[%c0_1, %c0_2] : memref<128x128xf32, #tpu.memory_space<vmem>>, vector<128x128xf32>
    %cst = arith.constant dense<0.000000e+00> : vector<8x128xf32>
    %2 = tpu.matmul %0, %1, %cst {dimension_numbers = #tpu.dot_dimension_numbers<[1], [0], [0], [1], [0, 0, 1, 1], [], []>} : vector<8x128xf32>, vector<128x128xf32>, vector<8x128xf32> -> vector<8x128xf32>
    %c0_3 = arith.constant 0 : index
    %c0_4 = arith.constant 0 : index
    %3 = vector.load %arg3[%c0_3, %c0_4] : memref<1x128xf32, #tpu.memory_space<vmem>>, vector<1x128xf32>
    %4 = vector.broadcast %3 : vector<1x128xf32> to vector<8x128xf32>
    %5 = arith.addf %2, %4 : vector<8x128xf32>
    %c0_5 = arith.constant 0 : index
    %c0_6 = arith.constant 0 : index
    %6 = vector.load %arg4[%c0_5, %c0_6] : memref<8x128xf32, #tpu.memory_space<vmem>>, vector<8x128xf32>
    tpu.vector_store %arg4[%c0_5, %c0_6], %5 {strides = array<i32>} : memref<8x128xf32, #tpu.memory_space<vmem>>, vector<8x128xf32>,
    return
  }
  func.func @transform_0(%arg0: i32) -> (i32, i32) {
    %c0_i32 = arith.constant 0 : i32
    %c0_i32_0 = arith.constant 0 : i32
    return %arg0, %c0_i32 : i32, i32
  }
  func.func @transform_1(%arg0: i32) -> (i32, i32) {
    %c0_i32 = arith.constant 0 : i32
    %c0_i32_0 = arith.constant 0 : i32
    %c0_i32_1 = arith.constant 0 : i32
    return %c0_i32, %c0_i32_0 : i32, i32
  }
  func.func @transform_2(%arg0: i32) -> (i32, i32) {
    %c0_i32 = arith.constant 0 : i32
    %c0_i32_0 = arith.constant 0 : i32
    %c0_i32_1 = arith.constant 0 : i32
    return %c0_i32, %c0_i32_0 : i32, i32
  }
  func.func @transform_3(%arg0: i32) -> (i32, i32) {
    %c0_i32 = arith.constant 0 : i32
    %c0_i32_0 = arith.constant 0 : i32
    return %arg0, %c0_i32 : i32, i32
  }
}

</mosaic_0001>

<bundles_post_ra>
// kernel: nsp_forward.1
= control target key start
LH: loop header
LB: loop body
LE: loop exit
PB: predicated region body
PF: predicated region fallthrough
CT: control target
= control target key end

     0   :  { %8 = vsyncpa [#allocation3], 0  ;;  %s235_s12 = smov [#allocation2]   ;;  %s282_s0 = inlined_call_operand.vmem [shape: f32[8,128], index: 0, kind: input, shape index: {}]   ;;  %s283_s1 = inlined_call_operand.hbm [shape: f32[128,128], index: 1, kind: input, shape index: {}]   ;;  %s284_s2 = inlined_call_operand.vmem [shape: f32[1,128], index: 2, kind: input, shape index: {}]   ;;  %s285_s3 = inlined_call_operand.vmem [shape: f32[8,128], index: 3, kind: output, shape index: {}]  }
   0x1   :  { %s16_s13 = sshll.u32 %s235_s12, 4  ;;  %s211_s16 = scalar_lea.hbm %s283_s1, 2048  ;;  %s17_s13 = int_to_ptr.vmem [resolvable:$true] %s16_s13 }
   0x2   :  { %p212_p0 = scmp.ne.s32.totalorder %s283_s1, %s211_s16  ;;  %p215_p1 = scmp.lt.u32.totalorder %s211_s16, %s283_s1 }
   0x4   :  { %p217_p2 = pnand %p215_p1, %p212_p0 }
   0x6   :  { %220 = shalt.err (!%p217_p2)
}
   0x7   :  { %s221_s21 = scalar_lea.vmem %s17_s13, 2048  ;;  %p226_p4 = scmp.lt.s32.totalorder %s17_s13, %s17_s13 }
   0x8   :  { %p222_p3 = scmp.ne.s32.totalorder %s17_s13, %s221_s21  ;;  %p227_p5 = scmp.lt.s32.totalorder %s221_s21, %s221_s21 }
   0xa   :  { %p228_p6 = por %p227_p5, %p226_p4 }
   0xc   :  { %p229_p7 = pnand %p228_p6, %p222_p3 }
   0xe   :  { %232 = shalt.err (!%p229_p7)
}
   0xf   :  { %s236_s22 = smov 128   ;;  %s237_s23 = smov 8  }
  0x10   :  { %22 = dma.hbm_to_vmem [thread:$0]  %s283_s1, 2048, %s17_s13, [#allocation3], %s236_s22, %s236_s22, %s237_s23  }
  0x11   :  { %233 = dma.done.wait [#allocation3], 2048  }
  0x12   :  { %234 = vsyncadd [#allocation3], 4294965248  ;;  %v238_v0 = vmov 0.0|0.0   ;;  %vm239_vm0 = vmmov 0   ;;  %v240_v1 = vmov 0.0   ;;  %v29_v2 = vld [vmem:[#allocation2] sm:$0xff] }
  0x13   :  { %181 = vmatprep.subr.bf16.mxu0 %v238_v0  ;;  %178 = vmatprep.mubr.msk.f32.mxu0 %vm239_vm0, %v240_v1  ;;  %v30_v3 = vld [vmem:[#allocation2 + $0x8] sm:$0xff]  ;;  %v31_v4 = vld [vmem:[#allocation2 + $0x10] sm:$0xff]  ;;  %v32_v6 = vld [vmem:[#allocation2 + $0x18] sm:$0xff] }
  0x14   :  { %v182_v5 = vpack.c.bf16 %v30_v3, %v29_v2  ;;  %v185_v7 = vpack.c.bf16 %v32_v6, %v31_v4  ;;  %v33_v8 = vld [vmem:[#allocation2 + $0x20] sm:$0xff]  ;;  %v34_v9 = vld [vmem:[#allocation2 + $0x28] sm:$0xff]  ;;  %v35_v11 = vld [vmem:[#allocation2 + $0x30] sm:$0xff] }
  0x15   :  { %v188_v10 = vpack.c.bf16 %v34_v9, %v33_v8  ;;  %v36_v12 = vld [vmem:[#allocation2 + $0x38] sm:$0xff]  ;;  %v37_v14 = vld [vmem:[#allocation2 + $0x40] sm:$0xff]  ;;  %v38_v15 = vld [vmem:[#allocation2 + $0x48] sm:$0xff] }
  0x16   :  { %183 = vmatpush3.bf16.msra.mxu0 %v182_v5  ;;  %v191_v13 = vpack.c.bf16 %v36_v12, %v35_v11  ;;  %v194_v16 = vpack.c.bf16 %v38_v15, %v37_v14  ;;  %v39_v17 = vld [vmem:[#allocation2 + $0x50] sm:$0xff]  ;;  %v40_v18 = vld [vmem:[#allocation2 + $0x58] sm:$0xff]  ;;  %v41_v20 = vld [vmem:[#allocation2 + $0x60] sm:$0xff] }
  0x17   :  { %184 = vmatprep.subr.bf16.mxu0 %v238_v0  ;;  %v197_v19 = vpack.c.bf16 %v40_v18, %v39_v17  ;;  %v42_v21 = vld [vmem:[#allocation2 + $0x68] sm:$0xff]  ;;  %v43_v23 = vld [vmem:[#allocation2 + $0x70] sm:$0xff]  ;;  %v44_v24 = vld [vmem:[#allocation2 + $0x78] sm:$0xff] }
  0x18   :  { %v200_v22 = vpack.c.bf16 %v42_v21, %v41_v20  ;;  %v203_v25 = vpack.c.bf16 %v44_v24, %v43_v23  ;;  %v28_v26 = vld [vmem:[%s282_s0] sm:$0xff] }
  0x19   :  { %v128_v27 = vld [vmem:[%s284_s2] ss:$0 sm:$0xff] }
  0x1a   :  { %186 = vmatpush3.bf16.msra.mxu0 %v185_v7 }
  0x1b   :  { %187 = vmatprep.subr.bf16.mxu0 %v238_v0 }
  0x1e   :  { %189 = vmatpush3.bf16.msra.mxu0 %v188_v10 }
  0x1f   :  { %190 = vmatprep.subr.bf16.mxu0 %v238_v0 }
  0x22   :  { %192 = vmatpush3.bf16.msra.mxu0 %v191_v13 }
  0x23   :  { %193 = vmatprep.subr.bf16.mxu0 %v238_v0 }
  0x26   :  { %195 = vmatpush3.bf16.msra.mxu0 %v194_v16 }
  0x27   :  { %196 = vmatprep.subr.bf16.mxu0 %v238_v0 }
  0x2a   :  { %198 = vmatpush3.bf16.msra.mxu0 %v197_v19 }
  0x2b   :  { %199 = vmatprep.subr.bf16.mxu0 %v238_v0 }
  0x2e   :  { %201 = vmatpush3.bf16.msra.mxu0 %v200_v22 }
  0x2f   :  { %202 = vmatprep.subr.bf16.mxu0 %v238_v0 }
  0x32   :  { %204 = vmatpush3.bf16.msra.mxu0 %v203_v25 }
  0x35   :  { %179 = vmatmul.mubr.f32.vlgmr.msra.gmra.mrb[0].mxu0 %v28_v26 }
 0x108   :  { %v118_v28 = vpop.f32.mrb[0].mxu0 }
 0x109   :  { %v119_v29 = vadd.f32 %v128_v27, %v118_v28  ;;  %v180_v30 = vpop.f32.mrb[1].mxu0 }
 0x10b   :  { %122 = vst [vmem:[%s285_s3] sm:$0xff] %v119_v29 }
 0x10c   :  { %127 = vsyncpa [#allocation3], 1 }

</bundles_post_ra>
